<compile_context>
chip_gen: v6e
topology: v6e:2x2x1
jax: 0.10.0
libtpu: 0.0.40
codegen_flags: <defaults>
</compile_context>

<pallas_src>
import functools

import jax
import jax.numpy as jnp
from jax.experimental import pallas as pl
from jax.experimental.pallas import tpu as pltpu


_TILE_M_MAX = 32768          # rows per grid step (upper bound)
_VMEM_BUDGET_BYTES = 26 << 20  # per-tile footprint target (headroom under cap)
_VMEM_LIMIT_BYTES = 32 << 20   # safe on v5e/v6e (128 MiB) and v7x (64 MiB)


def _round_up(x: int, n: int) -> int:
    return ((x + n - 1) // n) * n


# ----------------------------------------------------------------------------
# Kernel
# ----------------------------------------------------------------------------
def _apply_activation(name: str, h: jnp.ndarray) -> jnp.ndarray:
    if name == "identity":
        return h
    if name == "relu":
        return jnp.maximum(h, 0.0)
    if name == "tanh":
        return jnp.tanh(h)
    if name == "sigmoid":
        return jax.nn.sigmoid(h)           # stable; exp/recip go to the EUP
    if name == "leaky_relu":
        return jnp.where(h > 0.0, h, 0.01 * h)
    raise ValueError(f"unsupported activation: {name}")


def _mlp_kernel(*refs, activations: tuple[str, ...], n_layers: int):
    # refs = (x_ref, w_0, ..., w_{L-1}, o_ref); each is the VMEM tile for the
    # current grid step (weights are full arrays, pinned across steps).
    x_ref = refs[0]
    w_refs = refs[1:1 + n_layers]
    o_ref = refs[1 + n_layers]

    h = x_ref[...]
    for i in range(n_layers):
        w = w_refs[i][...]                 # (in_i, out_i) == torch W_i^T
        lhs = h if h.dtype == w.dtype else h.astype(w.dtype)
        # f32 accumulation regardless of operand dtype (bf16-friendly MXU path).
        h = jnp.dot(lhs, w, preferred_element_type=jnp.float32)
        h = _apply_activation(activations[i], h)

    # TODO(synk): the 8-wide output store is lane-masked (8/128 lanes).  A
    # lane-dense in-kernel repack (TILE_M, 8) -> (TILE_M//16, 128) would widen
    # the VMEM stores, but relies on a cross-lane reshape Mosaic does not
    # lower reliably; the HBM write-back DMA only moves real bytes anyway.
    o_ref[...] = h.astype(o_ref.dtype)


# ----------------------------------------------------------------------------
# Wrapper
# ----------------------------------------------------------------------------
def _estimate_tile_vmem_bytes(tile_m, in_dim, out_dim, max_width,
                              x_itemsize, weight_bytes):
    stream = 2 * tile_m * (in_dim + out_dim) * x_itemsize   # dbl-buffered x/out
    temps = 3 * tile_m * max_width * 4                      # live f32 temporaries
    return stream + 2 * weight_bytes + temps + (2 << 20)    # + headroom


def mlp_forward(x: jnp.ndarray,
                weights: list[jnp.ndarray],
                activations: list[str]) -> jnp.ndarray:
    """Apply the fused MLP Pallas kernel.

    x:        (..., nodes[0])
    weights:  list of (nodes[i], nodes[i+1]) matrices (i.e. torch W_i^T)
    """
    n_layers = len(weights)
    # pad activations with "identity" exactly like phlower's ExtendedLinearList
    acts = tuple(activations) + ("identity",) * (n_layers - len(activations))

    lead_shape = x.shape[:-1]
    in_dim = int(x.shape[-1])
    out_dim = int(weights[-1].shape[-1])
    m = 1
    for d in lead_shape:
        m *= int(d)
    x2d = x.reshape(m, in_dim)

    widths = [in_dim] + [int(w.shape[1]) for w in weights]
    max_width = max(widths)
    x_itemsize = jnp.dtype(x.dtype).itemsize
    weight_bytes = sum(int(w.size) * jnp.dtype(w.dtype).itemsize for w in weights)

    # --- row tiling over M: biggest tile that fits the VMEM budget ----------
    tile_m = min(_TILE_M_MAX, _round_up(max(m, 1), 8))      # multiple of 8 sublanes
    while (tile_m > 512 and
           _estimate_tile_vmem_bytes(tile_m, in_dim, out_dim, max_width,
                                     x_itemsize, weight_bytes)
           > _VMEM_BUDGET_BYTES):
        tile_m = _round_up(tile_m // 2, 8)
    grid_m = pl.cdiv(m, tile_m)           # ragged last block handled by Pallas

    kernel = functools.partial(_mlp_kernel, activations=acts, n_layers=n_layers)

    # Input/output stream over M; weights pinned to block (0, 0) so they stay
    # VMEM-resident across all grid steps.  Last block dims equal the full
    # array dims (16 / 32 / 8), satisfying the (8, 128) divisibility rule.
    in_specs = [pl.BlockSpec((tile_m, in_dim), lambda i: (i, 0))]
    for w in weights:
        in_specs.append(
            pl.BlockSpec(tuple(int(s) for s in w.shape), lambda i: (0, 0)))
    out_spec = pl.BlockSpec((tile_m, out_dim), lambda i: (i, 0))

    # Advisory cost estimate for XLA's scheduler.
    flops = 2 * m * sum(widths[i] * widths[i + 1] for i in range(n_layers))
    trans = m * sum(widths[i + 1] for i in range(n_layers)
                    if acts[i] in ("tanh", "sigmoid"))
    bytes_accessed = m * (in_dim + out_dim) * x_itemsize + weight_bytes

    out2d = pl.pallas_call(
        kernel,
        out_shape=jax.ShapeDtypeStruct((m, out_dim), x.dtype),
        grid_spec=pltpu.PrefetchScalarGridSpec(
            num_scalar_prefetch=0,
            grid=(grid_m,),
            in_specs=in_specs,
            out_specs=out_spec,
        ),
        compiler_params=pltpu.CompilerParams(
            dimension_semantics=("parallel",),     # megacore split on v7x
            vmem_limit_bytes=_VMEM_LIMIT_BYTES,
        ),
        cost_estimate=pl.CostEstimate(
            flops=int(flops),
            transcendentals=int(trans),
            bytes_accessed=int(bytes_accessed),
        ),
    )(x2d, *weights)

    return out2d.reshape(*lead_shape, out_dim)


# ----------------------------------------------------------------------------
# Pure-JAX reference (silent correctness check)
# ----------------------------------------------------------------------------
def mlp_reference(x, weights, activations):
    n_layers = len(weights)
    acts = list(activations) + ["identity"] * (n_layers - len(activations))
    h = x.astype(jnp.float32)
    for w, a in zip(weights, acts):
        h = h @ w.astype(jnp.float32)
        h = _apply_activation(a, h)
    return h.astype(x.dtype)


if __name__ == "__main__":
    # MLP(nodes=[16, 32, 32, 8], activations=["tanh", "relu", "identity"],
    #     bias=False)
    nodes = [16, 32, 32, 8]
    activations = ["tanh", "relu", "identity"]

    key = jax.random.PRNGKey(0)
    k_x, *k_w = jax.random.split(key, 1 + len(nodes) - 1)

    # input: batch=2, seq=8, feature=nodes[0]  -> (2, 8, 16)
    x = jax.random.normal(k_x, (2, 8, nodes[0]), dtype=jnp.float32)

    # deterministic weights; stored as (in, out) == torch W^T
    weights = []
    for i in range(len(nodes) - 1):
        fan_in = nodes[i]
        bound = 1.0 / (fan_in ** 0.5)
        w = jax.random.uniform(
            k_w[i], (nodes[i], nodes[i + 1]),
            minval=-bound, maxval=bound, dtype=jnp.float32)
        weights.append(w)

    out = mlp_forward(x, weights, activations)
    out = jax.block_until_ready(out)

    ref = mlp_reference(x, weights, activations)
    assert out.shape == (2, 8, nodes[-1])
    assert jnp.allclose(out, ref, atol=1e-5, rtol=1e-5)

    print("KERNEL_OK")
</pallas_src>

<mosaic_0001>
module attributes {stable_mosaic.version = 11 : i64} {
  func.func @_mlp_kernel(%arg0: i32, %arg1: memref<16x16xf32, #tpu.memory_space<vmem>>, %arg2: memref<16x32xf32, #tpu.memory_space<vmem>>, %arg3: memref<32x32xf32, #tpu.memory_space<vmem>>, %arg4: memref<32x8xf32, #tpu.memory_space<vmem>>, %arg5: memref<16x8xf32, #tpu.memory_space<vmem>>) attributes {dimension_semantics = [#tpu.dimension_semantics<parallel>], iteration_bounds = array<i64: 1>, scalar_prefetch = 0 : i64, scratch_operands = 0 : i64, tpu.core_type = #tpu.core_type<tc>, window_params = [{transform_indices = @transform_0, window_bounds = array<i64: 16, 16>}, {pipeline_mode = #tpu.pipeline_mode<synchronous>, transform_indices = @transform_1, window_bounds = array<i64: 16, 32>}, {pipeline_mode = #tpu.pipeline_mode<synchronous>, transform_indices = @transform_2, window_bounds = array<i64: 32, 32>}, {pipeline_mode = #tpu.pipeline_mode<synchronous>, transform_indices = @transform_3, window_bounds = array<i64: 32, 8>}, {transform_indices = @transform_4, window_bounds = array<i64: 16, 8>}]} {
    %c0 = arith.constant 0 : index
    %c0_0 = arith.constant 0 : index
    %0 = vector.load %arg1[%c0, %c0_0] : memref<16x16xf32, #tpu.memory_space<vmem>>, vector<16x16xf32>
    %c0_1 = arith.constant 0 : index
    %c0_2 = arith.constant 0 : index
    %1 = vector.load %arg2[%c0_1, %c0_2] : memref<16x32xf32, #tpu.memory_space<vmem>>, vector<16x32xf32>
    %cst = arith.constant dense<0.000000e+00> : vector<16x32xf32>
    %2 = tpu.matmul %0, %1, %cst {dimension_numbers = #tpu.dot_dimension_numbers<[1], [0], [0], [1], [0, 0, 1, 1], [], []>} : vector<16x16xf32>, vector<16x32xf32>, vector<16x32xf32> -> vector<16x32xf32>
    %3 = math.tanh %2 : vector<16x32xf32>
    %c0_3 = arith.constant 0 : index
    %c0_4 = arith.constant 0 : index
    %4 = vector.load %arg3[%c0_3, %c0_4] : memref<32x32xf32, #tpu.memory_space<vmem>>, vector<32x32xf32>
    %cst_5 = arith.constant dense<0.000000e+00> : vector<16x32xf32>
    %5 = tpu.matmul %3, %4, %cst_5 {dimension_numbers = #tpu.dot_dimension_numbers<[1], [0], [0], [1], [0, 0, 1, 1], [], []>} : vector<16x32xf32>, vector<32x32xf32>, vector<16x32xf32> -> vector<16x32xf32>
    %cst_6 = arith.constant 0.000000e+00 : f32
    %6 = vector.broadcast %cst_6 : f32 to vector<16x32xf32>
    %7 = arith.maximumf %5, %6 : vector<16x32xf32>
    %c0_7 = arith.constant 0 : index
    %c0_8 = arith.constant 0 : index
    %8 = vector.load %arg4[%c0_7, %c0_8] : memref<32x8xf32, #tpu.memory_space<vmem>>, vector<32x8xf32>
    %cst_9 = arith.constant dense<0.000000e+00> : vector<16x8xf32>
    %9 = tpu.matmul %7, %8, %cst_9 {dimension_numbers = #tpu.dot_dimension_numbers<[1], [0], [0], [1], [0, 0, 1, 1], [], []>} : vector<16x32xf32>, vector<32x8xf32>, vector<16x8xf32> -> vector<16x8xf32>
    %c0_10 = arith.constant 0 : index
    %c0_11 = arith.constant 0 : index
    %10 = vector.load %arg5[%c0_10, %c0_11] : memref<16x8xf32, #tpu.memory_space<vmem>>, vector<16x8xf32>
    tpu.vector_store %arg5[%c0_10, %c0_11], %9 {strides = array<i32>} : memref<16x8xf32, #tpu.memory_space<vmem>>, vector<16x8xf32>,
    return
  }
  func.func @transform_0(%arg0: i32) -> (i32, i32) {
    %c0_i32 = arith.constant 0 : i32
    %c0_i32_0 = arith.constant 0 : i32
    return %arg0, %c0_i32 : i32, i32
  }
  func.func @transform_1(%arg0: i32) -> (i32, i32) {
    %c0_i32 = arith.constant 0 : i32
    %c0_i32_0 = arith.constant 0 : i32
    %c0_i32_1 = arith.constant 0 : i32
    return %c0_i32, %c0_i32_0 : i32, i32
  }
  func.func @transform_2(%arg0: i32) -> (i32, i32) {
    %c0_i32 = arith.constant 0 : i32
    %c0_i32_0 = arith.constant 0 : i32
    %c0_i32_1 = arith.constant 0 : i32
    return %c0_i32, %c0_i32_0 : i32, i32
  }
  func.func @transform_3(%arg0: i32) -> (i32, i32) {
    %c0_i32 = arith.constant 0 : i32
    %c0_i32_0 = arith.constant 0 : i32
    %c0_i32_1 = arith.constant 0 : i32
    return %c0_i32, %c0_i32_0 : i32, i32
  }
  func.func @transform_4(%arg0: i32) -> (i32, i32) {
    %c0_i32 = arith.constant 0 : i32
    %c0_i32_0 = arith.constant 0 : i32
    return %arg0, %c0_i32 : i32, i32
  }
}

</mosaic_0001>

<bundles_post_ra>
// kernel: tpu_custom_call.1
= control target key start
LH: loop header
LB: loop body
LE: loop exit
PB: predicated region body
PF: predicated region fallthrough
CT: control target
= control target key end

     0   :  { %9 = vsyncpa [#allocation3], 0  ;;  %s487_s0 = inlined_call_operand.hbm [shape: f32[16,16], index: 0, kind: input, shape index: {}]   ;;  %s488_s1 = inlined_call_operand.hbm [shape: f32[16,32], index: 1, kind: input, shape index: {}]   ;;  %s489_s2 = inlined_call_operand.vmem [shape: f32[32,32], index: 2, kind: input, shape index: {}]   ;;  %s490_s3 = inlined_call_operand.vmem [shape: f32[32,8], index: 3, kind: input, shape index: {}]   ;;  %s491_s4 = inlined_call_operand.vmem [shape: f32[16,8], index: 4, kind: output, shape index: {}]  }
   0x1   :  { %10 = vsyncpa [#allocation5], 0  ;;  %s418_s15 = smov [#allocation2]  }
   0x2   :  { %s16_s16 = sshll.u32 %s418_s15, 4  ;;  %s17_s16 = int_to_ptr.vmem [resolvable:$true] %s16_s16 }
   0x3   :  { %s382_s17 = scalar_lea.vmem %s17_s16, 256  ;;  %p387_p1 = scmp.lt.s32.totalorder %s17_s16, %s17_s16 }
   0x4   :  { %p383_p0 = scmp.ne.s32.totalorder %s17_s16, %s382_s17  ;;  %p388_p2 = scmp.lt.s32.totalorder %s382_s17, %s382_s17 }
   0x6   :  { %p389_p3 = por %p388_p2, %p387_p1 }
   0x8   :  { %p390_p4 = pnand %p389_p3, %p383_p0 }
   0xa   :  { %393 = shalt.err (!%p390_p4)
}
   0xb   :  { %s419_s18 = smov 128   ;;  %s420_s19 = smov 8  }
   0xc   :  { %22 = dma.hbm_to_vmem [thread:$0]  %s487_s0, 256, %s17_s16, [#allocation3], %s419_s18, %s419_s18, %s420_s19  }
   0xd   :  { %s421_s22 = smov [#allocation4]  }
   0xe   :  { %s28_s23 = sshll.u32 %s421_s22, 4  ;;  %s29_s23 = int_to_ptr.vmem [resolvable:$true] %s28_s23 }
   0xf   :  { %s402_s24 = scalar_lea.vmem %s29_s23, 256  ;;  %p407_p6 = scmp.lt.s32.totalorder %s29_s23, %s29_s23 }
  0x10   :  { %p403_p5 = scmp.ne.s32.totalorder %s29_s23, %s402_s24  ;;  %p408_p7 = scmp.lt.s32.totalorder %s402_s24, %s402_s24 }
  0x12   :  { %p409_p8 = por %p408_p7, %p407_p6 }
  0x14   :  { %p410_p9 = pnand %p409_p8, %p403_p5 }
  0x16   :  { %413 = shalt.err (!%p410_p9)
}
  0x17   :  { %34 = dma.hbm_to_vmem [thread:$0]  %s488_s1, 256, %s29_s23, [#allocation5], %s419_s18, %s419_s18, %s420_s19  }
  0x18   :  { %414 = dma.done.wait [#allocation3], 256  }
  0x19   :  { %415 = vsyncadd [#allocation3], 4294967040 }
  0x1a   :  { %416 = dma.done.wait [#allocation5], 256  }
  0x1b   :  { %417 = vsyncadd [#allocation5], 4294967040  ;;  %vm49_vm0 = vcmask 130048   ;;  %v48_v0 = vld [vmem:[#allocation4 + $0x8] sm:$0xff]  ;;  %v47_v1 = vld [vmem:[#allocation4] sm:$0xff]  ;;  %vm137_vm1 = vcmask 261120  }
  0x1c   :  { %v45_v2 = vld [vmem:[#allocation2] sm:$0xff]  ;;  %337 = vmatprep.subr.mxu0 %v48_v0  ;;  %v46_v3 = vld [vmem:[#allocation2 + $0x8] sm:$0xff]  ;;  %v136_v4 = vld [vmem:[%s489_s2 + $0x18] sm:$0xff]  ;;  %vm306_vm2 = vcmask 64512  }
  0x1d   :  { %341 = vmatprep.mubr.msk.f32.mxu0 %vm49_vm0, %v45_v2  ;;  %338 = vmatpush3.msra.mxu0 %v48_v0  ;;  %v135_v5 = vld [vmem:[%s489_s2 + $0x10] sm:$0xff]  ;;  %v134_v6 = vld [vmem:[%s489_s2 + $0x8] sm:$0xff]  ;;  %v133_v7 = vld [vmem:[%s489_s2] sm:$0xff] }
  0x1e   :  { %339 = vmatprep.subr.mxu0 %v47_v1  ;;  %344 = vmatprep.subr.mxu1 %v136_v4  ;;  %v224_v8 = vld [vmem:[%s490_s3 + $0x18] sm:$0xff]  ;;  %v223_v13 = vld [vmem:[%s490_s3 + $0x10] sm:$0xff]  ;;  %v222_v14 = vld [vmem:[%s490_s3 + $0x8] sm:$0xff] }
  0x1f   :  { %340 = vmatpush3.msra.mxu0 %v47_v1  ;;  %345 = vmatpush3.msra.mxu1 %v136_v4  ;;  %v221_v15 = vld [vmem:[%s490_s3] sm:$0xff] }
  0x20   :  { %342 = vmatmul.mubr.msk.f32.vlgmr.msra.gmra.mxu0 %vm49_vm0, %v46_v3  ;;  %346 = vmatprep.subr.mxu1 %v135_v5 }
  0x21   :  { %347 = vmatpush3.msra.mxu1 %v135_v5  ;;  %355 = vmatprep.subr.mxu0 %v224_v8 }
  0x22   :  { %348 = vmatprep.subr.mxu1 %v134_v6  ;;  %356 = vmatpush3.msra.mxu0 %v224_v8 }
  0x23   :  { %349 = vmatpush3.msra.mxu1 %v134_v6  ;;  %357 = vmatprep.subr.mxu0 %v223_v13 }
  0x24   :  { %350 = vmatprep.subr.mxu1 %v133_v7  ;;  %358 = vmatpush3.msra.mxu0 %v223_v13 }
  0x25   :  { %351 = vmatpush3.msra.mxu1 %v133_v7  ;;  %359 = vmatprep.subr.mxu0 %v222_v14 }
  0x26   :  { %360 = vmatpush3.msra.mxu0 %v222_v14 }
  0x27   :  { %361 = vmatprep.subr.mxu0 %v221_v15 }
  0x28   :  { %362 = vmatpush3.msra.mxu0 %v221_v15 }
  0xe0   :  { %v343_v9 = vpop.f32.mrf.mxu0 }
  0xe2   :  { %v122_v10 = vpop.f32.mrf.mxu0 }
  0xe3   :  { %370 = vtanh.f32 %v122_v10 }
  0xe4   :  { %372 = vtanh.f32 %v343_v9 }
  0xf0   :  { %v371_v11 = vpop.eup %370 }
  0xf1   :  { %v373_v12 = vpop.eup %372  ;;  %352 = vmatprep.mubr.msk.f32.mxu1 %vm137_vm1, %v371_v11 }
  0xf2   :  { %353 = vmatmul.mubr.msk.f32.vlgmr.msra.gmra.mxu1 %vm137_vm1, %v373_v12 }
 0x1b2   :  { %v354_v16 = vpop.f32.mrf.mxu1 }
 0x1b3   :  { %v220_v19 = vmax.f32 %v354_v16, 0.0 }
 0x1b4   :  { %v210_v17 = vpop.f32.mrf.mxu1 }
 0x1b5   :  { %v219_v18 = vmax.f32 %v210_v17, 0.0 }
 0x1b7   :  { %363 = vmatprep.mubr.msk.f32.mxu0 %vm137_vm1, %v219_v18 }
 0x1b8   :  { %364 = vmatmul.mubr.msk.f32.vlgmr.msra.gmra.mxu0 %vm137_vm1, %v220_v19 }
 0x278   :  { %v365_v20 = vpop.f32.mrf.mxu0 }
 0x279   :  { %308 = vst.msk [vmem:[%s491_s4 + $0x8] sm:$0xff] %vm306_vm2, %v365_v20 }
 0x27a   :  { %v297_v21 = vpop.f32.mrf.mxu0 }
 0x27b   :  { %307 = vst.msk [vmem:[%s491_s4] sm:$0xff] %vm306_vm2, %v297_v21 }
 0x27c   :  { %313 = vsyncpa [#allocation3], 1 }
 0x27d   :  { %314 = vsyncpa [#allocation5], 1 }

</bundles_post_ra>
